<compile_context>
chip_gen: v7x
topology: tpu7x:2x2x1
jax: 0.10.0
libtpu: 0.0.40
codegen_flags: <defaults>
</compile_context>

<pallas_src>
import jax
import jax.numpy as jnp
from jax.experimental import pallas as pl
from jax.experimental.pallas import tpu as pltpu


def _round_up(x, m):
    return (x + m - 1) // m * m


def _batch_axis_semantics(num_blocks):
    # Plain "parallel" vs "arbitrary" is measured as a near no-op; only
    # CORE_PARALLEL actually shards the grid axis across the 2 TensorCores on
    # v7x. Guard by device kind + even grid so single-TC chips / odd grids
    # fall back cleanly.
    try:
        kind = jax.devices()[0].device_kind.lower()
    except Exception:  # pragma: no cover - defensive
        kind = ""
    if "v7" in kind and num_blocks >= 2 and num_blocks % 2 == 0:
        return (getattr(pltpu, "CORE_PARALLEL", pltpu.PARALLEL),)
    return (pltpu.PARALLEL,)


def meta_rnn_kernel(x_ref, w1_ref, b1_ref, w2_ref, b2_ref, q_ref, h_ref):
    w1 = w1_ref[...]                                  # [F, H] compute_dtype
    w2 = w2_ref[...]                                  # [H, A] compute_dtype
    # fc1 + relu: cast the tile to the MXU compute dtype in-kernel (input
    # stays f32 in HBM; no wrapper-side pad/cast pass). f32 accumulation.
    x = x_ref[...].astype(w1.dtype)                   # [TB, F]
    h = jnp.dot(x, w1, preferred_element_type=jnp.float32)      # [TB, H] f32
    h = jnp.maximum(h + b1_ref[...], 0.0)
    h_ref[...] = h.astype(h_ref.dtype)
    # fc2: true (unpadded) action width; masked stores are hidden under DMA.
    q = jnp.dot(h.astype(w2.dtype), w2,
                preferred_element_type=jnp.float32) + b2_ref[...]
    q_ref[...] = q.astype(q_ref.dtype)


def meta_rnn_agent_forward(inputs, hidden_state, w1, b1, w2, b2, *,
                           block_b=8192, compute_dtype=jnp.bfloat16,
                           out_dtype=jnp.bfloat16, use_pallas=None):
    """inputs: [B, F], hidden_state: [*, H] (unused by the forward pass).

    w1: [F, H] (= fc1.weight.T), b1: [H]
    w2: [H, A] (= fc2.weight.T), b2: [A]
    Returns (q [B, A], x [B, H]) in out_dtype.

    compute_dtype=jnp.float32 gives a bit-faithful MXU path if exact parity
    with the f32 PyTorch forward (e.g. for argmax action selection) matters.
    """
    # TODO(synk): hidden_state is reshaped but never used in the PyTorch
    # forward; it is accepted here for interface fidelity only.
    del hidden_state

    B, F = inputs.shape
    H = w1.shape[1]
    A = w2.shape[1]

    if use_pallas is None:
        use_pallas = B >= 512
    if not use_pallas:
        # Small-batch bypass: a single-step custom call is dominated by launch
        # + DMA latency; fused XLA matmuls match or beat it at these sizes.
        x = jnp.maximum(
            jnp.dot(inputs.astype(compute_dtype), w1.astype(compute_dtype),
                    preferred_element_type=jnp.float32) + b1, 0.0)
        q = jnp.dot(x.astype(compute_dtype), w2.astype(compute_dtype),
                    preferred_element_type=jnp.float32) + b2
        return q.astype(out_dtype), x.astype(out_dtype)

    # Batch tile: large (default 8192) and a multiple of 8; shrink for tiny B.
    TB = max(8, min(_round_up(block_b, 8), _round_up(B, 8)))
    num_blocks = pl.cdiv(B, TB)
    grid = (num_blocks,)

    # Weights/biases: tiny, cast once, VMEM-resident via index_map -> (0, 0).
    w1_c = w1.astype(compute_dtype)                   # [F, H]
    b1_2d = b1.reshape(1, H).astype(jnp.float32)      # [1, H]
    w2_c = w2.astype(compute_dtype)                   # [H, A]
    b2_2d = b2.reshape(1, A).astype(jnp.float32)      # [1, A]

    out_isize = jnp.dtype(out_dtype).itemsize
    in_isize = jnp.dtype(inputs.dtype).itemsize
    w_isize = jnp.dtype(compute_dtype).itemsize
    flops = 2 * B * (F * H + H * A)
    bytes_accessed = (B * F * in_isize                # inputs (read as-is)
                      + F * H * w_isize               # w1
                      + H * A * w_isize               # w2
                      + (H + A) * 4                   # biases
                      + B * A * out_isize             # q out (unpadded)
                      + B * H * out_isize)            # x out

    q_out, x_out = pl.pallas_call(
        meta_rnn_kernel,
        grid=grid,
        in_specs=[
            pl.BlockSpec((TB, F), lambda i: (i, 0)),   # inputs tile (pipelined)
            pl.BlockSpec((F, H), lambda i: (0, 0)),    # w1 (resident)
            pl.BlockSpec((1, H), lambda i: (0, 0)),    # b1 (resident)
            pl.BlockSpec((H, A), lambda i: (0, 0)),    # w2 (resident)
            pl.BlockSpec((1, A), lambda i: (0, 0)),    # b2 (resident)
        ],
        out_specs=(
            pl.BlockSpec((TB, A), lambda i: (i, 0)),   # q (true width)
            pl.BlockSpec((TB, H), lambda i: (i, 0)),   # x
        ),
        out_shape=(
            jax.ShapeDtypeStruct((B, A), out_dtype),
            jax.ShapeDtypeStruct((B, H), out_dtype),
        ),
        compiler_params=pltpu.CompilerParams(
            dimension_semantics=_batch_axis_semantics(num_blocks),
        ),
        cost_estimate=pl.CostEstimate(
            flops=flops, transcendentals=0, bytes_accessed=bytes_accessed),
    )(inputs, w1_c, b1_2d, w2_c, b2_2d)

    return q_out, x_out


def _kaiming_normal(key, out_features, in_features):
    # kaiming_normal (fan_in mode, default a=0): std = sqrt(2 / fan_in)
    std = (2.0 / in_features) ** 0.5
    return jax.random.normal(key, (out_features, in_features), jnp.float32) * std


def _reference(inputs, w1, b1, w2, b2, compute_dtype=jnp.bfloat16):
    # Plain-JAX reference with the same MXU-operand / f32-accumulate recipe.
    x = jnp.maximum(
        jnp.dot(inputs.astype(compute_dtype), w1.astype(compute_dtype),
                preferred_element_type=jnp.float32) + b1, 0.0)
    q = jnp.dot(x.astype(compute_dtype), w2.astype(compute_dtype),
                preferred_element_type=jnp.float32) + b2
    return q, x


if __name__ == "__main__":
    # Small shapes: batch=2 (agents*batch), input_shape=32, hidden=32, n_actions=8
    B = 2
    INPUT_SHAPE = 32
    RNN_HIDDEN_DIM = 32
    N_ACTIONS = 8

    key = jax.random.PRNGKey(0)
    k_in, k_w1, k_b1, k_w2, k_b2, k_in2 = jax.random.split(key, 6)

    inputs = jax.random.normal(k_in, (B, INPUT_SHAPE), jnp.float32)
    hidden_state = jnp.zeros((B, RNN_HIDDEN_DIM), jnp.float32)  # init_hidden()

    # fc1 / fc2 parameters (kaiming-normal weights like _weights_init)
    w1_torch = _kaiming_normal(k_w1, RNN_HIDDEN_DIM, INPUT_SHAPE)   # [H, F]
    b1 = jax.random.uniform(k_b1, (RNN_HIDDEN_DIM,), jnp.float32,
                            -1.0 / INPUT_SHAPE ** 0.5, 1.0 / INPUT_SHAPE ** 0.5)
    w2_torch = _kaiming_normal(k_w2, N_ACTIONS, RNN_HIDDEN_DIM)     # [A, H]
    b2 = jax.random.uniform(k_b2, (N_ACTIONS,), jnp.float32,
                            -1.0 / RNN_HIDDEN_DIM ** 0.5, 1.0 / RNN_HIDDEN_DIM ** 0.5)

    # Pre-transpose for the kernel's row-major layout.
    w1 = w1_torch.T  # [F, H]
    w2 = w2_torch.T  # [H, A]

    # --- 1. Small demo batch: force the Pallas path so the kernel runs. ---
    q, x = meta_rnn_agent_forward(inputs, hidden_state, w1, b1, w2, b2,
                                  use_pallas=True)
    q = jax.block_until_ready(q)
    x = jax.block_until_ready(x)
    assert q.shape == (B, N_ACTIONS) and x.shape == (B, RNN_HIDDEN_DIM)

    q_ref, x_ref = _reference(inputs, w1, b1, w2, b2)
    assert jnp.allclose(x.astype(jnp.float32), x_ref, atol=2e-2, rtol=2e-2)
    assert jnp.allclose(q.astype(jnp.float32), q_ref, atol=2e-2, rtol=2e-2)

    # --- 2. Larger batch through the tiled path (multiple grid steps, ragged
    #        last block handled by Pallas masking). ---
    B2 = 3000
    inputs2 = jax.random.normal(k_in2, (B2, INPUT_SHAPE), jnp.float32)
    hidden2 = jnp.zeros((B2, RNN_HIDDEN_DIM), jnp.float32)
    q2, x2 = meta_rnn_agent_forward(inputs2, hidden2, w1, b1, w2, b2,
                                    block_b=1024)
    q2 = jax.block_until_ready(q2)
    x2 = jax.block_until_ready(x2)
    assert q2.shape == (B2, N_ACTIONS) and x2.shape == (B2, RNN_HIDDEN_DIM)

    q2_ref, x2_ref = _reference(inputs2, w1, b1, w2, b2)
    assert jnp.allclose(x2.astype(jnp.float32), x2_ref, atol=2e-2, rtol=2e-2)
    assert jnp.allclose(q2.astype(jnp.float32), q2_ref, atol=2e-2, rtol=2e-2)

    print("KERNEL_OK")
</pallas_src>

<mosaic_0001>
module attributes {stable_mosaic.version = 11 : i64} {
  func.func @meta_rnn_kernel(%arg0: i32, %arg1: memref<8x32xf32, #tpu.memory_space<vmem>>, %arg2: memref<32x32xbf16, #tpu.memory_space<vmem>>, %arg3: memref<1x32xf32, #tpu.memory_space<vmem>>, %arg4: memref<32x8xbf16, #tpu.memory_space<vmem>>, %arg5: memref<1x8xf32, #tpu.memory_space<vmem>>, %arg6: memref<8x8xbf16, #tpu.memory_space<vmem>>, %arg7: memref<8x32xbf16, #tpu.memory_space<vmem>>) attributes {dimension_semantics = [#tpu.dimension_semantics<parallel>], iteration_bounds = array<i64: 1>, scalar_prefetch = 0 : i64, scratch_operands = 0 : i64, tpu.core_type = #tpu.core_type<tc>, window_params = [{transform_indices = @transform_0, window_bounds = array<i64: 8, 32>}, {pipeline_mode = #tpu.pipeline_mode<synchronous>, transform_indices = @transform_1, window_bounds = array<i64: 32, 32>}, {pipeline_mode = #tpu.pipeline_mode<synchronous>, transform_indices = @transform_2, window_bounds = array<i64: 1, 32>}, {pipeline_mode = #tpu.pipeline_mode<synchronous>, transform_indices = @transform_3, window_bounds = array<i64: 32, 8>}, {pipeline_mode = #tpu.pipeline_mode<synchronous>, transform_indices = @transform_4, window_bounds = array<i64: 1, 8>}, {transform_indices = @transform_5, window_bounds = array<i64: 8, 8>}, {transform_indices = @transform_6, window_bounds = array<i64: 8, 32>}]} {
    %c0 = arith.constant 0 : index
    %c0_0 = arith.constant 0 : index
    %0 = vector.load %arg2[%c0, %c0_0] : memref<32x32xbf16, #tpu.memory_space<vmem>>, vector<32x32xbf16>
    %c0_1 = arith.constant 0 : index
    %c0_2 = arith.constant 0 : index
    %1 = vector.load %arg4[%c0_1, %c0_2] : memref<32x8xbf16, #tpu.memory_space<vmem>>, vector<32x8xbf16>
    %c0_3 = arith.constant 0 : index
    %c0_4 = arith.constant 0 : index
    %2 = vector.load %arg1[%c0_3, %c0_4] : memref<8x32xf32, #tpu.memory_space<vmem>>, vector<8x32xf32>
    %3 = arith.truncf %2 : vector<8x32xf32> to vector<8x32xbf16>
    %cst = arith.constant dense<0.000000e+00> : vector<8x32xf32>
    %4 = tpu.matmul %3, %0, %cst {dimension_numbers = #tpu.dot_dimension_numbers<[1], [0], [0], [1], [0, 0, 1, 1], [], []>} : vector<8x32xbf16>, vector<32x32xbf16>, vector<8x32xf32> -> vector<8x32xf32>
    %c0_5 = arith.constant 0 : index
    %c0_6 = arith.constant 0 : index
    %5 = vector.load %arg3[%c0_5, %c0_6] : memref<1x32xf32, #tpu.memory_space<vmem>>, vector<1x32xf32>
    %6 = vector.broadcast %5 : vector<1x32xf32> to vector<8x32xf32>
    %7 = arith.addf %4, %6 : vector<8x32xf32>
    %cst_7 = arith.constant 0.000000e+00 : f32
    %8 = vector.broadcast %cst_7 : f32 to vector<8x32xf32>
    %9 = arith.maximumf %7, %8 : vector<8x32xf32>
    %10 = arith.truncf %9 : vector<8x32xf32> to vector<8x32xbf16>
    %c0_8 = arith.constant 0 : index
    %c0_9 = arith.constant 0 : index
    %11 = vector.load %arg7[%c0_8, %c0_9] : memref<8x32xbf16, #tpu.memory_space<vmem>>, vector<8x32xbf16>
    tpu.vector_store %arg7[%c0_8, %c0_9], %10 {strides = array<i32>} : memref<8x32xbf16, #tpu.memory_space<vmem>>, vector<8x32xbf16>,
    %12 = arith.truncf %9 : vector<8x32xf32> to vector<8x32xbf16>
    %cst_10 = arith.constant dense<0.000000e+00> : vector<8x8xf32>
    %13 = tpu.matmul %12, %1, %cst_10 {dimension_numbers = #tpu.dot_dimension_numbers<[1], [0], [0], [1], [0, 0, 1, 1], [], []>} : vector<8x32xbf16>, vector<32x8xbf16>, vector<8x8xf32> -> vector<8x8xf32>
    %c0_11 = arith.constant 0 : index
    %c0_12 = arith.constant 0 : index
    %14 = vector.load %arg5[%c0_11, %c0_12] : memref<1x8xf32, #tpu.memory_space<vmem>>, vector<1x8xf32>
    %15 = vector.broadcast %14 : vector<1x8xf32> to vector<8x8xf32>
    %16 = arith.addf %13, %15 : vector<8x8xf32>
    %17 = arith.truncf %16 : vector<8x8xf32> to vector<8x8xbf16>
    %c0_13 = arith.constant 0 : index
    %c0_14 = arith.constant 0 : index
    %18 = vector.load %arg6[%c0_13, %c0_14] : memref<8x8xbf16, #tpu.memory_space<vmem>>, vector<8x8xbf16>
    tpu.vector_store %arg6[%c0_13, %c0_14], %17 {strides = array<i32>} : memref<8x8xbf16, #tpu.memory_space<vmem>>, vector<8x8xbf16>,
    return
  }
  func.func @transform_0(%arg0: i32) -> (i32, i32) {
    %c0_i32 = arith.constant 0 : i32
    %c0_i32_0 = arith.constant 0 : i32
    return %arg0, %c0_i32 : i32, i32
  }
  func.func @transform_1(%arg0: i32) -> (i32, i32) {
    %c0_i32 = arith.constant 0 : i32
    %c0_i32_0 = arith.constant 0 : i32
    %c0_i32_1 = arith.constant 0 : i32
    return %c0_i32, %c0_i32_0 : i32, i32
  }
  func.func @transform_2(%arg0: i32) -> (i32, i32) {
    %c0_i32 = arith.constant 0 : i32
    %c0_i32_0 = arith.constant 0 : i32
    %c0_i32_1 = arith.constant 0 : i32
    return %c0_i32, %c0_i32_0 : i32, i32
  }
  func.func @transform_3(%arg0: i32) -> (i32, i32) {
    %c0_i32 = arith.constant 0 : i32
    %c0_i32_0 = arith.constant 0 : i32
    %c0_i32_1 = arith.constant 0 : i32
    return %c0_i32, %c0_i32_0 : i32, i32
  }
  func.func @transform_4(%arg0: i32) -> (i32, i32) {
    %c0_i32 = arith.constant 0 : i32
    %c0_i32_0 = arith.constant 0 : i32
    %c0_i32_1 = arith.constant 0 : i32
    return %c0_i32, %c0_i32_0 : i32, i32
  }
  func.func @transform_5(%arg0: i32) -> (i32, i32) {
    %c0_i32 = arith.constant 0 : i32
    %c0_i32_0 = arith.constant 0 : i32
    return %arg0, %c0_i32 : i32, i32
  }
  func.func @transform_6(%arg0: i32) -> (i32, i32) {
    %c0_i32 = arith.constant 0 : i32
    %c0_i32_0 = arith.constant 0 : i32
    return %arg0, %c0_i32 : i32, i32
  }
}

</mosaic_0001>

<bundles_post_ra>
// kernel: tpu_custom_call.1
= control target key start
LH: loop header
LB: loop body
LE: loop exit
PB: predicated region body
PF: predicated region fallthrough
CT: control target
= control target key end

     0   :  { %12 = vsyncpa [#allocation3], 0  ;;  %s441_s0 = inlined_call_operand.vmem [shape: f32[2,32], index: 0, kind: input, shape index: {}]   ;;  %s442_s1 = inlined_call_operand.vmem [shape: bf16[32,32], index: 1, kind: input, shape index: {}]   ;;  %s443_s2 = inlined_call_operand.vmem [shape: f32[1,32], index: 2, kind: input, shape index: {}]   ;;  %s444_s3 = inlined_call_operand.vmem [shape: bf16[32,8], index: 3, kind: input, shape index: {}]   ;;  %s445_s4 = inlined_call_operand.vmem [shape: f32[1,8], index: 4, kind: input, shape index: {}]   ;;  %s446_s5 = inlined_call_operand.hbm [shape: bf16[2,8], index: 5, kind: output, shape index: {0}]   ;;  %s447_s6 = inlined_call_operand.hbm [shape: bf16[2,32], index: 6, kind: output, shape index: {1}]  }
   0x1   :  { %13 = vsyncpa [#allocation5], 0  ;;  %v300_v0 = vld [vmem:[%s442_s1] sm:$0xff]   ;;  %v352_v1 = vmov 0.0   ;;  %v301_v2 = vld [vmem:[%s442_s1 + $0x8] sm:$0xff]   ;;  %vm353_vm0 = vmmov 0   ;;  %v104_v9 = vlaneseq }
   0x2   :  { %277 = vmatprep.subr.bf16.mxu0 %v352_v1  ;;  %285 = vmatprep.subr.bf16.mxu1 %v352_v1  ;;  %v33_v3 = vld [vmem:[%s441_s0] sm:$0xff]  ;;  %vm54_vm1 = vcmask 261120   ;;  %v303_v6 = vld [vmem:[%s444_s3 + $0x8] sm:$0xff]   ;;  %v354_v7 = vmov 1966171168   ;;  %vm129_vm2 = vcmask 253952  }
   0x3   :  { %278 = vmatpush3.bf16.msra.mxu0 %v300_v0  ;;  %281 = vmatprep.mubr.msk.bf16.mxu0 %vm353_vm0, %v352_v1  ;;  %v34_v4 = vpack.c.bf16 %v33_v3, %v33_v3  ;;  %v302_v5 = vld [vmem:[%s444_s3] sm:$0xff]   ;;  %v102_v8 = vunpack.c.l.s4 %v354_v7  ;;  %v105_v12 = vshrl.u32 %v104_v9, 7  ;;  %vm226_vm3 = vcmask 57344  }
   0x4   :  { %279 = vmatprep.subr.bf16.mxu0 %v352_v1  ;;  %289 = vmatprep.mubr.msk.bf16.mxu1 %vm353_vm0, %v352_v1  ;;  %v263_v10 = vld [vmem:[%s443_s2] ss:$0 sm:$0xff] }
   0x5   :  { %286 = vmatpush3.bf16.msra.mxu1 %v302_v5  ;;  %v103_v11 = vunpack.c.0.s8 %v102_v8  ;;  %v267_v27 = vld [vmem:[%s445_s4] ss:$0 sm:$0xff] }
   0x6   :  { %287 = vmatprep.subr.bf16.mxu1 %v352_v1 }
   0x7   :  { %280 = vmatpush3.bf16.msra.mxu0 %v301_v2  ;;  %v106_v18 = vsub.s32 %v103_v11, %v105_v12 }
   0x9   :  { %288 = vmatpush3.bf16.msra.mxu1 %v303_v6 }
   0xa   :  { %282 = vmatmul.mubr.msk.bf16.vlgmr.msra.gmra.mrb[0].mxu0 %vm54_vm1, %v34_v4 }
  0xdd   :  { %v92_v13 = vpop.f32.mrb[0].mxu0 }
  0xde   :  { %v93_v14 = vadd.f32 %v263_v10, %v92_v13  ;;  %v283_v15 = vpop.f32.mrb[1].mxu0 }
  0xdf   :  { %v95_v16 = vpop.f32.mrb[2].mxu0 }
  0xe0   :  { %v98_v17 = vmax.f32 %v93_v14, 0.0  ;;  %v284_v19 = vpop.f32.mrb[3].mxu0 }
  0xe2   :  { %v99_v20 = vpack.c.bf16 %v98_v17, %v98_v17 }
  0xe4   :  { %v107_v21 = vrot.slane %v99_v20, %v106_v18  ;;  %290 = vmatmul.mubr.msk.bf16.vlgmr.msra.gmra.mrb[0].mxu1 %vm54_vm1, %v99_v20 }
  0xe6   :  { %v108_v22 = vcombine.high %v107_v21, %v107_v21  ;;  %v115_v23 = vrot.slane %v107_v21, %v106_v18 }
  0xe8   :  { %v122_v24 = vrot.slane %v108_v22, %v106_v18  ;;  %v123_v25 = vcombine.high %v115_v23, %v115_v23  ;;  %130 = vst.msk [vmem:[#allocation4] sm:$0x1] %vm129_vm2, %v115_v23 }
  0xea   :  { %v124_v26 = vcombine.high %v122_v24, %v122_v24  ;;  %131 = vst.msk [vmem:[#allocation4 + $0x1] sm:$0x1] %vm129_vm2, %v122_v24  ;;  %132 = vst.msk [vmem:[#allocation4 + $0x2] sm:$0x1] %vm129_vm2, %v123_v25 }
  0xec   :  { %133 = vst.msk [vmem:[#allocation4 + $0x3] sm:$0x1] %vm129_vm2, %v124_v26 }
 0x1b7   :  { %v190_v28 = vpop.f32.mrb[0].mxu1 }
 0x1b8   :  { %v191_v29 = vadd.f32 %v267_v27, %v190_v28  ;;  %v291_v30 = vpop.f32.mrb[1].mxu1 }
 0x1b9   :  { %v193_v31 = vpop.f32.mrb[2].mxu1 }
 0x1ba   :  { %v196_v32 = vpack.c.bf16 %v191_v29, %v191_v29  ;;  %v292_v33 = vpop.f32.mrb[3].mxu1 }
 0x1bc   :  { %v204_v34 = vrot.slane %v196_v32, %v106_v18 }
 0x1be   :  { %v205_v35 = vcombine.high %v204_v34, %v204_v34  ;;  %v212_v36 = vrot.slane %v204_v34, %v106_v18 }
 0x1c0   :  { %v219_v37 = vrot.slane %v205_v35, %v106_v18  ;;  %v220_v38 = vcombine.high %v212_v36, %v212_v36  ;;  %227 = vst.msk [vmem:[#allocation2] sm:$0x1] %vm226_vm3, %v212_v36 }
 0x1c2   :  { %v221_v39 = vcombine.high %v219_v37, %v219_v37  ;;  %228 = vst.msk [vmem:[#allocation2 + $0x1] sm:$0x1] %vm226_vm3, %v219_v37  ;;  %229 = vst.msk [vmem:[#allocation2 + $0x2] sm:$0x1] %vm226_vm3, %v220_v38 }
 0x1c4   :  { %230 = vst.msk [vmem:[#allocation2 + $0x3] sm:$0x1] %vm226_vm3, %v221_v39 }
 0x1c5   :  { %235 = vsyncadd [#allocation3], 48  ;;  %s355_s7 = smov [#allocation2]  }
 0x1c6   :  { %s236_s4 = sshll.u32 %s355_s7, 4  ;;  %s237_s4 = int_to_ptr.vmem [resolvable:$true] %s236_s4 }
 0x1c7   :  { %s304_s8 = scalar_lea.vmem %s237_s4, 16  ;;  %s308_s9 = scalar_lea.vmem %s237_s4, 64 }
 0x1c8   :  { %p305_p0 = scmp.ne.s32.totalorder %s237_s4, %s304_s8  ;;  %p309_p1 = scmp.lt.s32.totalorder %s237_s4, %s237_s4 }
 0x1c9   :  { %p310_p2 = scmp.lt.s32.totalorder %s308_s9, %s304_s8 }
 0x1cb   :  { %p311_p3 = por %p310_p2, %p309_p1 }
 0x1cd   :  { %p312_p4 = pnand %p311_p3, %p305_p0 }
 0x1cf   :  { %315 = shalt.err (!%p312_p4)
}
 0x1d0   :  { %s316_s12 = scalar_lea.hbm %s446_s5, 16 }
 0x1d1   :  { %p317_p5 = scmp.ne.s32.totalorder %s446_s5, %s316_s12  ;;  %p320_p6 = scmp.lt.u32.totalorder %s316_s12, %s446_s5 }
 0x1d3   :  { %p322_p7 = pnand %p320_p6, %p317_p5 }
 0x1d5   :  { %325 = shalt.err (!%p322_p7)
}
 0x1d6   :  { %s356_s17 = smov 16   ;;  %s357_s18 = smov 1  }
 0x1d7   :  { %242 = dma.vmem_to_hbm [thread:$0]  %s237_s4, 16, %s446_s5, [#allocation3], %s356_s17, %s356_s17, %s357_s18  }
 0x1d8   :  { %247 = vsyncadd [#allocation5], 48  ;;  %s358_s21 = smov [#allocation4]  }
 0x1d9   :  { %s248_s22 = sshll.u32 %s358_s21, 4  ;;  %s249_s22 = int_to_ptr.vmem [resolvable:$true] %s248_s22 }
 0x1da   :  { %s326_s23 = scalar_lea.vmem %s249_s22, 16  ;;  %s330_s24 = scalar_lea.vmem %s249_s22, 64 }
 0x1db   :  { %p327_p8 = scmp.ne.s32.totalorder %s249_s22, %s326_s23  ;;  %p331_p9 = scmp.lt.s32.totalorder %s249_s22, %s249_s22 }
 0x1dc   :  { %p332_p10 = scmp.lt.s32.totalorder %s330_s24, %s326_s23 }
 0x1de   :  { %p333_p11 = por %p332_p10, %p331_p9 }
 0x1e0   :  { %p334_p12 = pnand %p333_p11, %p327_p8 }
 0x1e2   :  { %337 = shalt.err (!%p334_p12)
}
 0x1e3   :  { %s338_s27 = scalar_lea.hbm %s447_s6, 16 }
 0x1e4   :  { %p339_p13 = scmp.ne.s32.totalorder %s447_s6, %s338_s27  ;;  %p342_p0 = scmp.lt.u32.totalorder %s338_s27, %s447_s6 }
 0x1e6   :  { %p344_p1 = pnand %p342_p0, %p339_p13 }
 0x1e8   :  { %347 = shalt.err (!%p344_p1)
}
 0x1e9   :  { %254 = dma.vmem_to_hbm [thread:$0]  %s249_s22, 16, %s447_s6, [#allocation5], %s356_s17, %s356_s17, %s357_s18  }
 0x1ea   :  { %348 = dma.done.wait [#allocation3], 64  }
 0x1eb   :  { %349 = vsyncadd [#allocation3], 4294967232 }
 0x1ec   :  { %350 = dma.done.wait [#allocation5], 64  }
 0x1ed   :  { %351 = vsyncadd [#allocation5], 4294967232 }
 0x1ee   :  { %261 = vsyncpa [#allocation3], 1 }
 0x1ef   :  { %262 = vsyncpa [#allocation5], 1 }

</bundles_post_ra>
